<compile_context>
chip_gen: v5e
topology: v5e:2x2
jax: 0.10.0
libtpu: 0.0.40
codegen_flags: <defaults>
</compile_context>

<pallas_src>
import jax
import jax.numpy as jnp
from jax.experimental import pallas as pl
from jax.experimental.pallas import tpu as pltpu


def _disc_gat_kernel(x_ref, w_ref, b_ref, o_ref):
    # x_ref : (tb, H)       batch tile of x
    # w_ref : (H, Opad)     fused effective weight (lane-padded, zeros in pad)
    # b_ref : (1, Opad)     fused effective bias   (lane-padded, zeros in pad)
    # o_ref : (tb, Opad)
    y = jnp.dot(x_ref[...], w_ref[...], preferred_element_type=jnp.float32)
    o_ref[...] = (y + b_ref[...]).astype(o_ref.dtype)


def _pick_batch_tile(B):
    """Batch tile: 1 step for small B; otherwise large tiles but >=2 grid steps."""
    if B <= 256:
        return B
    # ceil(B/2) rounded up to a multiple of 8, capped at 2048 rows.
    tb = min(2048, ((-(-B // 2) + 7) // 8) * 8)
    return min(tb, B)


def discriminator_gat(x, h, w1, b1, w2, b2):
    """x: [B, H], h: [L, H], w1: [I, L*H], b1: [I], w2: [O, I], b2: [O] -> [B, O]"""
    B, H = x.shape
    L, H2 = h.shape
    assert H2 == H
    I, K = w1.shape
    assert K == L * H and b1.shape == (I,)
    O, I2 = w2.shape
    assert I2 == I and b2.shape == (O,)

    # --- one-time (per call) fused-weight construction in XLA, outside the grid ---
    # G[hh, i] = sum_l h[l, hh] * W1[i, l*H + hh]
    w1_3 = w1.reshape(I, L, H)                         # w1_3[i, l, hh] = W1[i, l*H+hh]
    g = jnp.einsum('lh,ilh->hi', h, w1_3)              # (H, I)
    w_eff = jnp.dot(g, w2.T)                           # (H, O)
    b_eff = jnp.dot(b1, w2.T) + b2                     # (O,)

    o_pad = ((O + 127) // 128) * 128                   # lane-dense output store
    w_eff_p = jnp.pad(w_eff, ((0, 0), (0, o_pad - O))).astype(x.dtype)   # (H, Opad)
    b_eff_p = jnp.pad(b_eff, (0, o_pad - O)).reshape(1, o_pad).astype(jnp.float32)

    tb = _pick_batch_tile(B)
    grid = (pl.cdiv(B, tb),)

    out = pl.pallas_call(
        _disc_gat_kernel,
        out_shape=jax.ShapeDtypeStruct((B, o_pad), x.dtype),
        grid_spec=pltpu.PrefetchScalarGridSpec(
            num_scalar_prefetch=0,
            grid=grid,
            in_specs=[
                pl.BlockSpec((tb, H), lambda i: (i, 0)),        # x batch tile
                pl.BlockSpec((H, o_pad), lambda i: (0, 0)),     # fused weight (shared)
                pl.BlockSpec((1, o_pad), lambda i: (0, 0)),     # fused bias (shared)
            ],
            out_specs=pl.BlockSpec((tb, o_pad), lambda i: (i, 0)),
        ),
        compiler_params=pltpu.CompilerParams(
            # Batch tiles shard across TensorCores on multi-TC chips (v7x).
            dimension_semantics=("parallel",),
        ),
    )(x, w_eff_p, b_eff_p)

    return out[:, :O] if o_pad != O else out


def _reference(x, h, w1, b1, w2, b2):
    B, H = x.shape
    L = h.shape[0]
    outer = x[:, None, :] * h[None, :, :]              # (B, L, H)
    flat = outer.reshape(B, L * H)                     # (B, L*H), index = l*H + hh
    return (flat @ w1.T + b1) @ w2.T + b2              # (B, L)


if __name__ == "__main__":
    # Shapes implied by the module: x [B, input_size], h [output_size, input_size]
    input_size = 32    # H
    output_size = 8    # L

    key = jax.random.PRNGKey(0)
    kx, kh, k1w, k1b, k2w, k2b, kx2 = jax.random.split(key, 7)

    h = jax.random.normal(kh, (output_size, input_size), dtype=jnp.float32)

    # nn.Linear-style init: U(-1/sqrt(fan_in), 1/sqrt(fan_in))
    fan1 = input_size * output_size
    bd1 = 1.0 / (fan1 ** 0.5)
    w1 = jax.random.uniform(k1w, (input_size, fan1), minval=-bd1, maxval=bd1,
                            dtype=jnp.float32)
    b1 = jax.random.uniform(k1b, (input_size,), minval=-bd1, maxval=bd1,
                            dtype=jnp.float32)
    bd2 = 1.0 / (input_size ** 0.5)
    w2 = jax.random.uniform(k2w, (output_size, input_size), minval=-bd2, maxval=bd2,
                            dtype=jnp.float32)
    b2 = jax.random.uniform(k2b, (output_size,), minval=-bd2, maxval=bd2,
                            dtype=jnp.float32)

    # --- small-batch path (single grid step) ---
    B = 2
    x = jax.random.normal(kx, (B, input_size), dtype=jnp.float32)
    y_hat = jax.block_until_ready(discriminator_gat(x, h, w1, b1, w2, b2))
    ref = _reference(x, h, w1, b1, w2, b2)
    assert y_hat.shape == (B, output_size)
    assert jnp.allclose(y_hat, ref, atol=1e-4, rtol=1e-4), \
        float(jnp.max(jnp.abs(y_hat - ref)))

    # --- tiled path (>= 2 grid steps, overhanging last tile) ---
    B2 = 300
    x2 = jax.random.normal(kx2, (B2, input_size), dtype=jnp.float32)
    y_hat2 = jax.block_until_ready(discriminator_gat(x2, h, w1, b1, w2, b2))
    ref2 = _reference(x2, h, w1, b1, w2, b2)
    assert y_hat2.shape == (B2, output_size)
    assert jnp.allclose(y_hat2, ref2, atol=1e-4, rtol=1e-4), \
        float(jnp.max(jnp.abs(y_hat2 - ref2)))

    print("KERNEL_OK")
</pallas_src>

<mosaic_0001>
module attributes {stable_mosaic.version = 11 : i64} {
  func.func @_disc_gat_kernel(%arg0: i32, %arg1: memref<2x32xf32, #tpu.memory_space<vmem>>, %arg2: memref<32x128xf32, #tpu.memory_space<vmem>>, %arg3: memref<1x128xf32, #tpu.memory_space<vmem>>, %arg4: memref<2x128xf32, #tpu.memory_space<vmem>>) attributes {dimension_semantics = [#tpu.dimension_semantics<parallel>], iteration_bounds = array<i64: 1>, scalar_prefetch = 0 : i64, scratch_operands = 0 : i64, tpu.core_type = #tpu.core_type<tc>, window_params = [{transform_indices = @transform_0, window_bounds = array<i64: 2, 32>}, {pipeline_mode = #tpu.pipeline_mode<synchronous>, transform_indices = @transform_1, window_bounds = array<i64: 32, 128>}, {pipeline_mode = #tpu.pipeline_mode<synchronous>, transform_indices = @transform_2, window_bounds = array<i64: 1, 128>}, {transform_indices = @transform_3, window_bounds = array<i64: 2, 128>}]} {
    %c0 = arith.constant 0 : index
    %c0_0 = arith.constant 0 : index
    %0 = vector.load %arg1[%c0, %c0_0] : memref<2x32xf32, #tpu.memory_space<vmem>>, vector<2x32xf32>
    %c0_1 = arith.constant 0 : index
    %c0_2 = arith.constant 0 : index
    %1 = vector.load %arg2[%c0_1, %c0_2] : memref<32x128xf32, #tpu.memory_space<vmem>>, vector<32x128xf32>
    %cst = arith.constant dense<0.000000e+00> : vector<2x128xf32>
    %2 = tpu.matmul %0, %1, %cst {dimension_numbers = #tpu.dot_dimension_numbers<[1], [0], [0], [1], [0, 0, 1, 1], [], []>} : vector<2x32xf32>, vector<32x128xf32>, vector<2x128xf32> -> vector<2x128xf32>
    %c0_3 = arith.constant 0 : index
    %c0_4 = arith.constant 0 : index
    %3 = vector.load %arg3[%c0_3, %c0_4] : memref<1x128xf32, #tpu.memory_space<vmem>>, vector<1x128xf32>
    %4 = vector.broadcast %3 : vector<1x128xf32> to vector<2x128xf32>
    %5 = arith.addf %2, %4 : vector<2x128xf32>
    %c0_5 = arith.constant 0 : index
    %c0_6 = arith.constant 0 : index
    %6 = vector.load %arg4[%c0_5, %c0_6] : memref<2x128xf32, #tpu.memory_space<vmem>>, vector<2x128xf32>
    tpu.vector_store %arg4[%c0_5, %c0_6], %5 {strides = array<i32>} : memref<2x128xf32, #tpu.memory_space<vmem>>, vector<2x128xf32>,
    return
  }
  func.func @transform_0(%arg0: i32) -> (i32, i32) {
    %c0_i32 = arith.constant 0 : i32
    %c0_i32_0 = arith.constant 0 : i32
    return %arg0, %c0_i32 : i32, i32
  }
  func.func @transform_1(%arg0: i32) -> (i32, i32) {
    %c0_i32 = arith.constant 0 : i32
    %c0_i32_0 = arith.constant 0 : i32
    %c0_i32_1 = arith.constant 0 : i32
    return %c0_i32, %c0_i32_0 : i32, i32
  }
  func.func @transform_2(%arg0: i32) -> (i32, i32) {
    %c0_i32 = arith.constant 0 : i32
    %c0_i32_0 = arith.constant 0 : i32
    %c0_i32_1 = arith.constant 0 : i32
    return %c0_i32, %c0_i32_0 : i32, i32
  }
  func.func @transform_3(%arg0: i32) -> (i32, i32) {
    %c0_i32 = arith.constant 0 : i32
    %c0_i32_0 = arith.constant 0 : i32
    return %arg0, %c0_i32 : i32, i32
  }
}

</mosaic_0001>

<bundles_post_ra>
// kernel: tpu_custom_call.1
= control target key start
LH: loop header
LB: loop body
LE: loop exit
PB: predicated region body
PF: predicated region fallthrough
CT: control target
= control target key end

     0   :  { %8 = vsyncpa [#allocation3], 0  ;;  %s219_s0 = inlined_call_operand.hbm [shape: f32[2,32], index: 0, kind: input, shape index: {}]   ;;  %s220_s1 = inlined_call_operand.hbm [shape: f32[32,128], index: 1, kind: input, shape index: {}]   ;;  %s221_s2 = inlined_call_operand.vmem [shape: f32[1,128], index: 2, kind: input, shape index: {}]   ;;  %s222_s3 = inlined_call_operand.hbm [shape: f32[2,128], index: 3, kind: output, shape index: {}]  }
   0x1   :  { %9 = vsyncpa [#allocation6], 0 }
   0x2   :  { %10 = vsyncpa [#allocation4], 0  ;;  %s16_s14 = sshll.u32 %s219_s0, 4  ;;  %s182_s15 = smov [#allocation2]   ;;  %s17_s14 = int_to_ptr.hbm [resolvable:$true] %s16_s14 }
   0x3   :  { %s18_s16 = sshll.u32 %s182_s15, 4  ;;  %s26_s19 = sshll.u32 %s220_s1, 4  ;;  %s19_s16 = int_to_ptr.vmem [resolvable:$true] %s18_s16  ;;  %s27_s19 = int_to_ptr.hbm [resolvable:$true] %s26_s19 }
   0x4   :  { %21 = dma.hbm_to_vmem [thread:$0]  %s17_s14, 32, %s19_s16, [#allocation3]  }
   0x5   :  { %s183_s20 = smov [#allocation5]   ;;  %s184_s22 = smov 128  }
   0x6   :  { %s28_s21 = sshll.u32 %s183_s20, 4  ;;  %s185_s23 = smov 8   ;;  %s29_s21 = int_to_ptr.vmem [resolvable:$true] %s28_s21 }
   0x7   :  { %34 = dma.hbm_to_vmem [thread:$0]  %s27_s19, 512, %s29_s21, [#allocation6], %s184_s22, %s184_s22, %s185_s23  }
   0x8   :  { %176 = dma.done.wait [#allocation3], 32  }
   0x9   :  { %177 = vsyncadd [#allocation3], 4294967264 }
   0xa   :  { %178 = dma.done.wait [#allocation6], 512  }
   0xb   :  { %179 = vsyncadd [#allocation6], 4294966784  ;;  %v49_v0 = vld [vmem:[#allocation5 + $0x18] sm:$0xff]  ;;  %v48_v1 = vld [vmem:[#allocation5 + $0x10] sm:$0xff]  ;;  %vm54_vm0 = vcmask 261120   ;;  %s186_s24 = smov [#allocation7]  }
   0xc   :  { %70 = vmatpush.msra.mxu0 %v49_v0  ;;  %v47_v2 = vld [vmem:[#allocation5 + $0x8] sm:$0xff]  ;;  %v46_v3 = vld [vmem:[#allocation5] sm:$0xff]  ;;  %v45_v4 = vld [vmem:[#allocation2] sm:$0x3]  ;;  %s84_s25 = sshll.u32 %s186_s24, 4  ;;  %s86_s28 = sshll.u32 %s222_s3, 4  ;;  %s85_s25 = int_to_ptr.vmem [resolvable:$true] %s84_s25  ;;  %s87_s28 = int_to_ptr.hbm [resolvable:$true] %s86_s28 }
   0xd   :  { %v103_v5 = vld [vmem:[%s221_s2] ss:$0 sm:$0xff] }
   0xe   :  { %71 = vmatpush.msra.mxu0 %v48_v1 }
  0x10   :  { %72 = vmatpush.msra.mxu0 %v47_v2 }
  0x12   :  { %73 = vmatpush.msra.mxu0 %v46_v3 }
  0x13   :  { %97 = vmatmul.msk.f32.vlgmr.msra.gmra.mxu0 %vm54_vm0, %v45_v4 }
  0x90   :  { %v75_v6 = vpop.f32.mrf.mxu0 }
  0x91   :  { %v76_v7 = vadd.f32 %v103_v5, %v75_v6 }
  0x93   :  { %78 = vst [vmem:[#allocation7] sm:$0x3] %v76_v7 }
  0x94   :  { %89 = dma.vmem_to_hbm [thread:$0]  %s85_s25, 32, %s87_s28, [#allocation4]  }
  0x95   :  { %180 = dma.done.wait [#allocation4], 32  }
  0x96   :  { %181 = vsyncadd [#allocation4], 4294967264 }
  0x97   :  { %94 = vsyncpa [#allocation3], 1 }
  0x98   :  { %95 = vsyncpa [#allocation6], 1 }
  0x99   :  { %96 = vsyncpa [#allocation4], 1 }

</bundles_post_ra>
